<compile_context>
chip_gen: v5e
topology: v5e:2x2
jax: 0.10.0
libtpu: 0.0.40
codegen_flags: <defaults>
</compile_context>

<pallas_src>
import functools
import math

import jax
import jax.numpy as jnp
from jax.experimental import pallas as pl
from jax.experimental.pallas import tpu as pltpu

LN_EPS = 1e-5
NUM_HEADS = 4


def _round_up(x, m):
    return ((x + m - 1) // m) * m


def _layernorm(x, gamma, beta):
    mu = jnp.mean(x, axis=-1, keepdims=True)
    xc = x - mu
    var = jnp.mean(xc * xc, axis=-1, keepdims=True)
    return xc * jax.lax.rsqrt(var + LN_EPS) * gamma + beta


def _gelu_exact(x):
    # PyTorch nn.GELU() default is the exact erf formulation.
    return 0.5 * x * (1.0 + jax.lax.erf(x * (1.0 / math.sqrt(2.0))))


# ----------------------------------- kernel -----------------------------------
def quantum_consciousness_kernel(
    x_ref,       # (TB, input_dim)      bf16 input tile
    w_ref,       # (RW, HN+C)           bf16 packed matmul weights: w1t|w2t|wcat|vg
    f_ref,       # (RF, HN)             f32 packed: bias/LN rows, gbc, gsum
    out_ref,     # (TB, C)              f32
    *, in_dim, C, D2, HN, H, rows,
):
    f32, bf16 = jnp.float32, jnp.bfloat16
    rw1, rw2, rwc, rvg = rows["w1t"], rows["w2t"], rows["wcat"], rows["vg"]
    rpv, rgbc, rgsum = rows["pv"], rows["gbc"], rows["gsum"]

    # packed small vectors (single (8, HN) f32 load)
    pv = f_ref[rpv:rpv + 8, :]
    b1, ln1_g, ln1_b = pv[0:1, :D2], pv[1:2, :D2], pv[2:3, :D2]
    b2 = pv[3:4, :C]
    bqk = pv[4:5, :HN]
    bgp, lng_g, lng_b = pv[5:6, :C], pv[6:7, :C], pv[7:8, :C]
    gbc = f_ref[rgbc:rgbc + H, :HN]        # (H, HN)  0/1 head-broadcast indicator
    gsum = f_ref[rgsum:rgsum + HN, :H]     # (HN, H)  0/1 head-sum indicator

    x = x_ref[...]                                                    # bf16

    # ---- holographic transform: Linear -> LayerNorm -> GELU -> Linear ----
    w1t = w_ref[rw1:rw1 + in_dim, :D2]
    h1 = jnp.dot(x, w1t, preferred_element_type=f32) + b1             # (TB, 2C) f32
    h1 = _gelu_exact(_layernorm(h1, ln1_g, ln1_b))                    # f32 elementwise
    w2t = w_ref[rw2:rw2 + D2, :C]
    h = jnp.dot(h1.astype(bf16), w2t, preferred_element_type=f32) + b2  # (TB, C) f32

    # ---- one fused matmul for both consumers of h ----
    #   lanes [0, HN)    -> attention scores with normalize+q-proj folded into keys
    #   lanes [HN, HN+C) -> holographic half of the integration gate
    wcat = w_ref[rwc:rwc + C, :]
    hw = jnp.dot(h.astype(bf16), wcat, preferred_element_type=f32)    # (TB, HN+C)
    s = hw[:, :HN] + bqk
    g_h = hw[:, HN:]

    # ---- per-head softmax over each head's n_q-lane group (f32) ----
    # Row-global max is a valid stabilizer (softmax is shift invariant); the denom
    # clamp keeps the approximate reciprocal finite even if a whole head underflows.
    e = jnp.exp(s - jnp.max(s, axis=-1, keepdims=True))               # (TB, HN)
    denom = jnp.maximum(jnp.dot(e, gsum, preferred_element_type=f32), 1e-30)
    bc = jnp.dot(pl.reciprocal(denom, approx=True), gbc,
                 preferred_element_type=f32)                          # (TB, HN)
    p = e * bc                                                        # softmax weights

    # ---- value matmul with out-proj + gate "entangled" half folded in ----
    vg = w_ref[rvg:rvg + HN, :C]
    g_ent = jnp.dot(p.astype(bf16), vg, preferred_element_type=f32)   # (TB, C)

    # ---- integration gate (LayerNorm + sigmoid in f32) and output ----
    gate = jax.nn.sigmoid(_layernorm(g_h + g_ent + bgp, lng_g, lng_b))
    out_ref[...] = h * gate


# ----------------------- one-time host-side preparation ------------------------
def prepare_inputs(p):
    """Fold batch-independent algebra, pre-transpose, pack into two slabs."""
    f32, bf16 = jnp.float32, jnp.bfloat16
    C = p["w2"].shape[0]
    in_dim = p["w1"].shape[1]
    D2 = 2 * C
    n_q = p["qstates"].shape[0]
    assert n_q == C, "module is only shape-consistent when n_quantum_states == consciousness_dim"
    H = NUM_HEADS
    assert C % H == 0
    hd = C // H
    HN = H * n_q
    scale = 1.0 / math.sqrt(hd)

    qs = p["qstates"].astype(f32)
    qs_unit = qs / jnp.maximum(jnp.linalg.norm(qs, axis=-1, keepdims=True), 1e-12)

    # keys / values are parameters, not activations -> hoist their projections
    k_proj = qs @ p["wk"].T + p["bk"]            # (n_q, C)
    v_proj = qs @ p["wv"].T + p["bv"]            # (n_q, C)

    # block-diagonal per-head key / value matrices (scale folded into the keys)
    kbig = jnp.zeros((C, HN), f32)
    vbig = jnp.zeros((HN, C), f32)
    for hh in range(H):
        cs = slice(hh * hd, (hh + 1) * hd)
        ks = slice(hh * n_q, (hh + 1) * n_q)
        kbig = kbig.at[cs, ks].set(k_proj[:, cs].T * scale)
        vbig = vbig.at[ks, cs].set(v_proj[:, cs])

    # fold F.normalize + q in-projection into the keys (review #1)
    whq = qs_unit.T @ p["wq"].T                  # (C, C): h -> q_proj (minus bias)
    kprime = whq @ kbig                          # (C, HN)
    bqk = (p["bq"] @ kbig).reshape(-1)           # (HN,)

    # fold attention out-proj + gate's entangled half into the values (review #2)
    wot = p["wo"].T                              # (C, C)
    wget = p["wg"][:, C:].T                      # (C, C)
    vg = vbig @ wot @ wget                       # (HN, C)
    bgp = (p["bg"] + p["bo"] @ wget).reshape(-1)  # (C,)

    # fuse both consumers of h into one matmul (review #3)
    wght = p["wg"][:, :C].T                      # (C, C)
    wcat = jnp.concatenate([kprime, wght], axis=1)   # (C, HN + C)

    # ---- pack all matmul weights into one bf16 slab (review #8) ----
    W = HN + C

    def wpad(m, rows16):
        m = m.astype(f32)
        return jnp.pad(m, ((0, rows16 - m.shape[0]), (0, W - m.shape[1])))

    r_w1, n_w1 = 0, _round_up(in_dim, 16)
    r_w2, n_w2 = r_w1 + n_w1, _round_up(D2, 16)
    r_wc, n_wc = r_w2 + n_w2, _round_up(C, 16)
    r_vg, n_vg = r_wc + n_wc, _round_up(HN, 16)
    wslab = jnp.concatenate(
        [wpad(p["w1"].T, n_w1), wpad(p["w2"].T, n_w2),
         wpad(wcat, n_wc), wpad(vg, n_vg)], axis=0).astype(bf16)      # (RW, HN+C)

    # ---- pack biases / LN affine / softmax indicators into one f32 slab ----
    def frow(v):
        v = jnp.reshape(v.astype(f32), (-1,))
        return jnp.pad(v, (0, HN - v.shape[0]))

    pv = jnp.stack([frow(p["b1"]), frow(p["ln1_g"]), frow(p["ln1_b"]),
                    frow(p["b2"]), frow(bqk), frow(bgp),
                    frow(p["lng_g"]), frow(p["lng_b"])], axis=0)      # (8, HN)
    gsum = jnp.kron(jnp.eye(H, dtype=f32), jnp.ones((n_q, 1), f32))   # (HN, H)
    gbc_pad = jnp.pad(gsum.T, ((0, 8 - H), (0, 0)))                   # (8, HN)
    gsum_pad = jnp.pad(gsum, ((0, 0), (0, HN - H)))                   # (HN, HN)
    fslab = jnp.concatenate([pv, gbc_pad, gsum_pad], axis=0)          # (16+HN, HN)

    meta = dict(in_dim=in_dim, C=C, D2=D2, HN=HN, H=H,
                rows=dict(w1t=r_w1, w2t=r_w2, wcat=r_wc, vg=r_vg,
                          pv=0, gbc=8, gsum=16))
    return dict(wslab=wslab, fslab=fslab, meta=meta)


# ---------------------------------- wrapper ------------------------------------
def _choose_batch_tiling(B, tile_b):
    """Pick (tile, padded_B).  Big tiles amortize the ~0.35us per-grid-step
    overhead (review #5); when the batch spans more than one tile the step count
    is kept even / >= 2 so dimension_semantics=("parallel",) balances v7x's two
    TensorCores (review #6); no-op for single-TC v5e/v6e."""
    Bp8 = _round_up(max(B, 1), 8)
    cap = max(_round_up(tile_b, 8), 8)
    if Bp8 <= cap:
        if Bp8 >= 16:
            tb = _round_up((Bp8 + 1) // 2, 8)
            return tb, 2 * tb
        return Bp8, Bp8
    n_steps = -(-Bp8 // cap)
    if n_steps % 2:
        n_steps += 1
    tb = _round_up(-(-Bp8 // n_steps), 8)
    return tb, n_steps * tb


def quantum_consciousness_forward(x, prep, *, tile_b=1024):
    meta = prep["meta"]
    C, in_dim = meta["C"], meta["in_dim"]
    B = x.shape[0]
    assert x.shape[1] == in_dim

    # bf16 matmul operands (review #4); accumulation and elementwise math stay f32.
    x = x.astype(jnp.bfloat16)
    tb, Bp = _choose_batch_tiling(B, tile_b)
    if Bp != B:
        x = jnp.pad(x, ((0, Bp - B), (0, 0)))   # padded rows are trimmed below

    wslab, fslab = prep["wslab"], prep["fslab"]
    kernel = functools.partial(
        quantum_consciousness_kernel,
        in_dim=in_dim, C=C, D2=meta["D2"], HN=meta["HN"], H=meta["H"],
        rows=meta["rows"])

    out = pl.pallas_call(
        kernel,
        out_shape=jax.ShapeDtypeStruct((Bp, C), jnp.float32),
        grid=(Bp // tb,),
        in_specs=[
            pl.BlockSpec((tb, in_dim), lambda i: (i, 0)),
            pl.BlockSpec(wslab.shape, lambda i: (0, 0)),   # grid-invariant slab
            pl.BlockSpec(fslab.shape, lambda i: (0, 0)),   # grid-invariant slab
        ],
        out_specs=pl.BlockSpec((tb, C), lambda i: (i, 0)),
        compiler_params=pltpu.CompilerParams(
            dimension_semantics=("parallel",)),
    )(x, wslab, fslab)
    return out[:B]


# ----------------------------- reference (pure JAX f32) --------------------------
def reference_forward(x, p):
    h1 = x @ p["w1"].T + p["b1"]
    mu = jnp.mean(h1, -1, keepdims=True)
    var = jnp.mean((h1 - mu) ** 2, -1, keepdims=True)
    h1 = (h1 - mu) / jnp.sqrt(var + LN_EPS) * p["ln1_g"] + p["ln1_b"]
    h1 = 0.5 * h1 * (1.0 + jax.lax.erf(h1 / math.sqrt(2.0)))
    h = h1 @ p["w2"].T + p["b2"]

    qs = p["qstates"]
    qs_unit = qs / jnp.maximum(jnp.linalg.norm(qs, axis=-1, keepdims=True), 1e-12)
    sp = h @ qs_unit.T

    q_proj = sp @ p["wq"].T + p["bq"]
    k_proj = qs @ p["wk"].T + p["bk"]
    v_proj = qs @ p["wv"].T + p["bv"]
    C = q_proj.shape[-1]
    hd = C // NUM_HEADS
    outs = []
    for hh in range(NUM_HEADS):
        sl = slice(hh * hd, (hh + 1) * hd)
        s = (q_proj[:, sl] @ k_proj[:, sl].T) / math.sqrt(hd)
        pw = jax.nn.softmax(s, axis=-1)
        outs.append(pw @ v_proj[:, sl])
    ent = jnp.concatenate(outs, -1) @ p["wo"].T + p["bo"]

    comb = jnp.concatenate([h, ent], -1)
    g = comb @ p["wg"].T + p["bg"]
    mu = jnp.mean(g, -1, keepdims=True)
    var = jnp.mean((g - mu) ** 2, -1, keepdims=True)
    g = (g - mu) / jnp.sqrt(var + LN_EPS) * p["lng_g"] + p["lng_b"]
    return h * jax.nn.sigmoid(g)


# --------------------------------- param init -----------------------------------
def init_params(key, input_dim, C, n_q):
    ks = jax.random.split(key, 16)

    def linear(kw, kb, out_d, in_d):
        bound = 1.0 / math.sqrt(in_d)
        w = jax.random.uniform(kw, (out_d, in_d), jnp.float32, -bound, bound)
        b = jax.random.uniform(kb, (1, out_d), jnp.float32, -bound, bound)
        return w, b

    w1, b1 = linear(ks[0], ks[1], 2 * C, input_dim)
    w2, b2 = linear(ks[2], ks[3], C, 2 * C)
    qstates = jax.random.normal(ks[4], (n_q, C), jnp.float32)
    in_proj = jax.random.normal(ks[5], (3 * C, C), jnp.float32) * math.sqrt(2.0 / (4 * C))
    wq, wk, wv = in_proj[:C], in_proj[C:2 * C], in_proj[2 * C:]
    bq = jnp.zeros((1, C), jnp.float32)
    bk = jnp.zeros((1, C), jnp.float32)
    bv = jnp.zeros((1, C), jnp.float32)
    wo, bo = linear(ks[6], ks[7], C, C)
    wg, bg = linear(ks[8], ks[9], C, 2 * C)
    return dict(
        w1=w1, b1=b1,
        ln1_g=jnp.ones((1, 2 * C), jnp.float32), ln1_b=jnp.zeros((1, 2 * C), jnp.float32),
        w2=w2, b2=b2,
        qstates=qstates,
        wq=wq, bq=bq, wk=wk, bk=bk, wv=wv, bv=bv, wo=wo, bo=bo,
        wg=wg, bg=bg,
        lng_g=jnp.ones((1, C), jnp.float32), lng_b=jnp.zeros((1, C), jnp.float32),
    )


if __name__ == "__main__":
    B, INPUT_DIM, C_DIM = 8, 16, 32
    N_QUANTUM = C_DIM  # must equal consciousness_dim for the MHA query shape to be valid

    key = jax.random.PRNGKey(0)
    kx, kp = jax.random.split(key)
    x = jax.random.normal(kx, (B, INPUT_DIM), jnp.float32)
    params = init_params(kp, INPUT_DIM, C_DIM, N_QUANTUM)

    prep = prepare_inputs(params)                 # one-time, batch-independent
    consciousness_state = quantum_consciousness_forward(x, prep)
    consciousness_state = jax.block_until_ready(consciousness_state)

    ref = reference_forward(x, params)
    assert consciousness_state.shape == (B, C_DIM)
    max_err = float(jnp.max(jnp.abs(consciousness_state - ref)))
    # tolerance reflects bf16 matmul operands (f32 accumulate) + approx reciprocal
    assert jnp.allclose(consciousness_state, ref, rtol=5e-2, atol=5e-2), (
        f"mismatch vs reference (max abs err {max_err})")

    print("KERNEL_OK")
</pallas_src>

<mosaic_0001>
module attributes {stable_mosaic.version = 11 : i64} {
  func.func @quantum_consciousness_kernel(%arg0: i32, %arg1: memref<8x16xbf16, #tpu.memory_space<vmem>>, %arg2: memref<240x160xbf16, #tpu.memory_space<vmem>>, %arg3: memref<144x128xf32, #tpu.memory_space<vmem>>, %arg4: memref<8x32xf32, #tpu.memory_space<vmem>>) attributes {dimension_semantics = [#tpu.dimension_semantics<parallel>], iteration_bounds = array<i64: 1>, scalar_prefetch = 0 : i64, scratch_operands = 0 : i64, tpu.core_type = #tpu.core_type<tc>, window_params = [{transform_indices = @transform_0, window_bounds = array<i64: 8, 16>}, {pipeline_mode = #tpu.pipeline_mode<synchronous>, transform_indices = @transform_1, window_bounds = array<i64: 240, 160>}, {pipeline_mode = #tpu.pipeline_mode<synchronous>, transform_indices = @transform_2, window_bounds = array<i64: 144, 128>}, {transform_indices = @transform_3, window_bounds = array<i64: 8, 32>}]} {
    %c0 = arith.constant 0 : index
    %c0_0 = arith.constant 0 : index
    %0 = vector.load %arg3[%c0, %c0_0] : memref<144x128xf32, #tpu.memory_space<vmem>>, vector<8x128xf32>
    %1 = vector.extract_strided_slice %0 {offsets = [0, 0], sizes = [1, 64], strides = [1, 1]} : vector<8x128xf32> to vector<1x64xf32>
    %2 = vector.extract_strided_slice %0 {offsets = [1, 0], sizes = [1, 64], strides = [1, 1]} : vector<8x128xf32> to vector<1x64xf32>
    %3 = vector.extract_strided_slice %0 {offsets = [2, 0], sizes = [1, 64], strides = [1, 1]} : vector<8x128xf32> to vector<1x64xf32>
    %4 = vector.extract_strided_slice %0 {offsets = [3, 0], sizes = [1, 32], strides = [1, 1]} : vector<8x128xf32> to vector<1x32xf32>
    %5 = vector.extract_strided_slice %0 {offsets = [4, 0], sizes = [1, 128], strides = [1, 1]} : vector<8x128xf32> to vector<1x128xf32>
    %6 = vector.extract_strided_slice %0 {offsets = [5, 0], sizes = [1, 32], strides = [1, 1]} : vector<8x128xf32> to vector<1x32xf32>
    %7 = vector.extract_strided_slice %0 {offsets = [6, 0], sizes = [1, 32], strides = [1, 1]} : vector<8x128xf32> to vector<1x32xf32>
    %8 = vector.extract_strided_slice %0 {offsets = [7, 0], sizes = [1, 32], strides = [1, 1]} : vector<8x128xf32> to vector<1x32xf32>
    %c8 = arith.constant 8 : index
    %c0_1 = arith.constant 0 : index
    %9 = vector.load %arg3[%c8, %c0_1] : memref<144x128xf32, #tpu.memory_space<vmem>>, vector<4x128xf32>
    %c16 = arith.constant 16 : index
    %c0_2 = arith.constant 0 : index
    %10 = vector.load %arg3[%c16, %c0_2] : memref<144x128xf32, #tpu.memory_space<vmem>>, vector<128x4xf32>
    %c0_3 = arith.constant 0 : index
    %c0_4 = arith.constant 0 : index
    %11 = vector.load %arg1[%c0_3, %c0_4] : memref<8x16xbf16, #tpu.memory_space<vmem>>, vector<8x16xbf16>
    %c0_5 = arith.constant 0 : index
    %c0_6 = arith.constant 0 : index
    %12 = vector.load %arg2[%c0_5, %c0_6] : memref<240x160xbf16, #tpu.memory_space<vmem>>, vector<16x64xbf16>
    %cst = arith.constant dense<0.000000e+00> : vector<8x64xf32>
    %13 = tpu.matmul %11, %12, %cst {dimension_numbers = #tpu.dot_dimension_numbers<[1], [0], [0], [1], [0, 0, 1, 1], [], []>} : vector<8x16xbf16>, vector<16x64xbf16>, vector<8x64xf32> -> vector<8x64xf32>
    %14 = vector.broadcast %1 : vector<1x64xf32> to vector<8x64xf32>
    %15 = arith.addf %13, %14 : vector<8x64xf32>
    %cst_7 = arith.constant dense<0.000000e+00> : vector<8xf32>
    %16 = vector.multi_reduction <add>, %15, %cst_7 [1] : vector<8x64xf32> to vector<8xf32>
    %17 = vector.shape_cast %16 : vector<8xf32> to vector<8x1xf32>
    %cst_8 = arith.constant 6.400000e+01 : f32
    %18 = vector.broadcast %cst_8 : f32 to vector<8x1xf32>
    %19 = arith.divf %17, %18 : vector<8x1xf32>
    %20 = vector.broadcast %19 : vector<8x1xf32> to vector<8x64xf32>
    %21 = arith.subf %15, %20 : vector<8x64xf32>
    %22 = arith.mulf %21, %21 : vector<8x64xf32>
    %cst_9 = arith.constant dense<0.000000e+00> : vector<8xf32>
    %23 = vector.multi_reduction <add>, %22, %cst_9 [1] : vector<8x64xf32> to vector<8xf32>
    %24 = vector.shape_cast %23 : vector<8xf32> to vector<8x1xf32>
    %cst_10 = arith.constant 6.400000e+01 : f32
    %25 = vector.broadcast %cst_10 : f32 to vector<8x1xf32>
    %26 = arith.divf %24, %25 : vector<8x1xf32>
    %cst_11 = arith.constant 9.99999974E-6 : f32
    %27 = vector.broadcast %cst_11 : f32 to vector<8x1xf32>
    %28 = arith.addf %26, %27 : vector<8x1xf32>
    %29 = math.rsqrt %28 : vector<8x1xf32>
    %30 = vector.broadcast %29 : vector<8x1xf32> to vector<8x64xf32>
    %31 = arith.mulf %21, %30 : vector<8x64xf32>
    %32 = vector.broadcast %2 : vector<1x64xf32> to vector<8x64xf32>
    %33 = arith.mulf %31, %32 : vector<8x64xf32>
    %34 = vector.broadcast %3 : vector<1x64xf32> to vector<8x64xf32>
    %35 = arith.addf %33, %34 : vector<8x64xf32>
    %cst_12 = arith.constant 5.000000e-01 : f32
    %36 = vector.broadcast %cst_12 : f32 to vector<8x64xf32>
    %37 = arith.mulf %36, %35 : vector<8x64xf32>
    %cst_13 = arith.constant 0.707106769 : f32
    %38 = vector.broadcast %cst_13 : f32 to vector<8x64xf32>
    %39 = arith.mulf %35, %38 : vector<8x64xf32>
    %40 = math.erf %39 : vector<8x64xf32>
    %cst_14 = arith.constant 1.000000e+00 : f32
    %41 = vector.broadcast %cst_14 : f32 to vector<8x64xf32>
    %42 = arith.addf %41, %40 : vector<8x64xf32>
    %43 = arith.mulf %37, %42 : vector<8x64xf32>
    %c16_15 = arith.constant 16 : index
    %c0_16 = arith.constant 0 : index
    %44 = vector.load %arg2[%c16_15, %c0_16] : memref<240x160xbf16, #tpu.memory_space<vmem>>, vector<64x32xbf16>
    %45 = arith.truncf %43 : vector<8x64xf32> to vector<8x64xbf16>
    %cst_17 = arith.constant dense<0.000000e+00> : vector<8x32xf32>
    %46 = tpu.matmul %45, %44, %cst_17 {dimension_numbers = #tpu.dot_dimension_numbers<[1], [0], [0], [1], [0, 0, 1, 1], [], []>} : vector<8x64xbf16>, vector<64x32xbf16>, vector<8x32xf32> -> vector<8x32xf32>
    %47 = vector.broadcast %4 : vector<1x32xf32> to vector<8x32xf32>
    %48 = arith.addf %46, %47 : vector<8x32xf32>
    %c80 = arith.constant 80 : index
    %c0_18 = arith.constant 0 : index
    %49 = vector.load %arg2[%c80, %c0_18] : memref<240x160xbf16, #tpu.memory_space<vmem>>, vector<32x160xbf16>
    %50 = arith.truncf %48 : vector<8x32xf32> to vector<8x32xbf16>
    %cst_19 = arith.constant dense<0.000000e+00> : vector<8x160xf32>
    %51 = tpu.matmul %50, %49, %cst_19 {dimension_numbers = #tpu.dot_dimension_numbers<[1], [0], [0], [1], [0, 0, 1, 1], [], []>} : vector<8x32xbf16>, vector<32x160xbf16>, vector<8x160xf32> -> vector<8x160xf32>
    %52 = vector.extract_strided_slice %51 {offsets = [0, 0], sizes = [8, 128], strides = [1, 1]} : vector<8x160xf32> to vector<8x128xf32>
    %53 = vector.broadcast %5 : vector<1x128xf32> to vector<8x128xf32>
    %54 = arith.addf %52, %53 : vector<8x128xf32>
    %55 = vector.extract_strided_slice %51 {offsets = [0, 128], sizes = [8, 32], strides = [1, 1]} : vector<8x160xf32> to vector<8x32xf32>
    %cst_20 = arith.constant dense<0xFF800000> : vector<8xf32>
    %56 = vector.multi_reduction <maximumf>, %54, %cst_20 [1] : vector<8x128xf32> to vector<8xf32>
    %57 = vector.shape_cast %56 : vector<8xf32> to vector<8x1xf32>
    %58 = vector.broadcast %57 : vector<8x1xf32> to vector<8x128xf32>
    %59 = arith.subf %54, %58 : vector<8x128xf32>
    %60 = math.exp %59 : vector<8x128xf32>
    %cst_21 = arith.constant dense<0.000000e+00> : vector<8x4xf32>
    %61 = tpu.matmul %60, %10, %cst_21 {dimension_numbers = #tpu.dot_dimension_numbers<[1], [0], [0], [1], [0, 0, 1, 1], [], []>} : vector<8x128xf32>, vector<128x4xf32>, vector<8x4xf32> -> vector<8x4xf32>
    %cst_22 = arith.constant 1.000000e-30 : f32
    %62 = vector.broadcast %cst_22 : f32 to vector<8x4xf32>
    %63 = arith.maximumf %61, %62 : vector<8x4xf32>
    %64 = tpu.reciprocal %63 {approx = true} : vector<8x4xf32> -> vector<8x4xf32>
    %cst_23 = arith.constant dense<0.000000e+00> : vector<8x128xf32>
    %65 = tpu.matmul %64, %9, %cst_23 {dimension_numbers = #tpu.dot_dimension_numbers<[1], [0], [0], [1], [0, 0, 1, 1], [], []>} : vector<8x4xf32>, vector<4x128xf32>, vector<8x128xf32> -> vector<8x128xf32>
    %66 = arith.mulf %60, %65 : vector<8x128xf32>
    %c112 = arith.constant 112 : index
    %c0_24 = arith.constant 0 : index
    %67 = vector.load %arg2[%c112, %c0_24] : memref<240x160xbf16, #tpu.memory_space<vmem>>, vector<128x32xbf16>
    %68 = arith.truncf %66 : vector<8x128xf32> to vector<8x128xbf16>
    %cst_25 = arith.constant dense<0.000000e+00> : vector<8x32xf32>
    %69 = tpu.matmul %68, %67, %cst_25 {dimension_numbers = #tpu.dot_dimension_numbers<[1], [0], [0], [1], [0, 0, 1, 1], [], []>} : vector<8x128xbf16>, vector<128x32xbf16>, vector<8x32xf32> -> vector<8x32xf32>
    %70 = arith.addf %55, %69 : vector<8x32xf32>
    %71 = vector.broadcast %6 : vector<1x32xf32> to vector<8x32xf32>
    %72 = arith.addf %70, %71 : vector<8x32xf32>
    %cst_26 = arith.constant dense<0.000000e+00> : vector<8xf32>
    %73 = vector.multi_reduction <add>, %72, %cst_26 [1] : vector<8x32xf32> to vector<8xf32>
    %74 = vector.shape_cast %73 : vector<8xf32> to vector<8x1xf32>
    %cst_27 = arith.constant 3.200000e+01 : f32
    %75 = vector.broadcast %cst_27 : f32 to vector<8x1xf32>
    %76 = arith.divf %74, %75 : vector<8x1xf32>
    %77 = vector.broadcast %76 : vector<8x1xf32> to vector<8x32xf32>
    %78 = arith.subf %72, %77 : vector<8x32xf32>
    %79 = arith.mulf %78, %78 : vector<8x32xf32>
    %cst_28 = arith.constant dense<0.000000e+00> : vector<8xf32>
    %80 = vector.multi_reduction <add>, %79, %cst_28 [1] : vector<8x32xf32> to vector<8xf32>
    %81 = vector.shape_cast %80 : vector<8xf32> to vector<8x1xf32>
    %cst_29 = arith.constant 3.200000e+01 : f32
    %82 = vector.broadcast %cst_29 : f32 to vector<8x1xf32>
    %83 = arith.divf %81, %82 : vector<8x1xf32>
    %cst_30 = arith.constant 9.99999974E-6 : f32
    %84 = vector.broadcast %cst_30 : f32 to vector<8x1xf32>
    %85 = arith.addf %83, %84 : vector<8x1xf32>
    %86 = math.rsqrt %85 : vector<8x1xf32>
    %87 = vector.broadcast %86 : vector<8x1xf32> to vector<8x32xf32>
    %88 = arith.mulf %78, %87 : vector<8x32xf32>
    %89 = vector.broadcast %7 : vector<1x32xf32> to vector<8x32xf32>
    %90 = arith.mulf %88, %89 : vector<8x32xf32>
    %91 = vector.broadcast %8 : vector<1x32xf32> to vector<8x32xf32>
    %92 = arith.addf %90, %91 : vector<8x32xf32>
    %93 = arith.negf %92 : vector<8x32xf32>
    %94 = math.exp %93 : vector<8x32xf32>
    %cst_31 = arith.constant 1.000000e+00 : f32
    %95 = vector.broadcast %cst_31 : f32 to vector<8x32xf32>
    %96 = arith.addf %95, %94 : vector<8x32xf32>
    %97 = arith.divf %95, %96 : vector<8x32xf32>
    %98 = arith.mulf %48, %97 : vector<8x32xf32>
    %c0_32 = arith.constant 0 : index
    %c0_33 = arith.constant 0 : index
    %99 = vector.load %arg4[%c0_32, %c0_33] : memref<8x32xf32, #tpu.memory_space<vmem>>, vector<8x32xf32>
    tpu.vector_store %arg4[%c0_32, %c0_33], %98 {strides = array<i32>} : memref<8x32xf32, #tpu.memory_space<vmem>>, vector<8x32xf32>,
    return
  }
  func.func @transform_0(%arg0: i32) -> (i32, i32) {
    %c0_i32 = arith.constant 0 : i32
    %c0_i32_0 = arith.constant 0 : i32
    return %arg0, %c0_i32 : i32, i32
  }
  func.func @transform_1(%arg0: i32) -> (i32, i32) {
    %c0_i32 = arith.constant 0 : i32
    %c0_i32_0 = arith.constant 0 : i32
    %c0_i32_1 = arith.constant 0 : i32
    return %c0_i32, %c0_i32_0 : i32, i32
  }
  func.func @transform_2(%arg0: i32) -> (i32, i32) {
    %c0_i32 = arith.constant 0 : i32
    %c0_i32_0 = arith.constant 0 : i32
    %c0_i32_1 = arith.constant 0 : i32
    return %c0_i32, %c0_i32_0 : i32, i32
  }
  func.func @transform_3(%arg0: i32) -> (i32, i32) {
    %c0_i32 = arith.constant 0 : i32
    %c0_i32_0 = arith.constant 0 : i32
    return %arg0, %c0_i32 : i32, i32
  }
}

</mosaic_0001>

<bundles_post_ra>
// kernel: tpu_custom_call.1
= control target key start
LH: loop header
LB: loop body
LE: loop exit
PB: predicated region body
PF: predicated region fallthrough
CT: control target
= control target key end

     0   :  { %s804_s0 = inlined_call_operand.vmem [shape: bf16[8,16], index: 0, kind: input, shape index: {}]   ;;  %s805_s1 = inlined_call_operand.vmem [shape: bf16[240,160], index: 1, kind: input, shape index: {}]   ;;  %s806_s2 = inlined_call_operand.vmem [shape: f32[144,128], index: 2, kind: input, shape index: {}]   ;;  %s807_s3 = inlined_call_operand.hbm [shape: f32[8,32], index: 3, kind: output, shape index: {}]  }
   0x1   :  { %v455_v0 = vld [vmem:[%s805_s1] sm:$0xf]  ;;  %v529_v1 = vld [vmem:[%s805_s1 + $0x4] sm:$0xf0] }
   0x2   :  { %v456_v2 = vor.u32 %v529_v1, %v455_v0 }
   0x3   :  { %8 = vsyncpa [#allocation3], 0  ;;  %v34_v3 = vld [vmem:[%s804_s0] sm:$0xf]  ;;  %vm44_vm0 = vcmask 130048   ;;  %vm61_vm1 = vcmask 523264  }
   0x4   :  { %55 = vmatpush.bf16.msra.mxu0 %v456_v2  ;;  %v628_v4 = vld [vmem:[%s806_s2] sm:$0xff]  ;;  %v593_v10 = vmov 64.0   ;;  %v533_v23 = vld [vmem:[%s805_s1 + $0x44] sm:$0xf0]  ;;  %v469_v24 = vld [vmem:[%s805_s1 + $0x30] sm:$0xf] }
   0x5   :  { %v37_v5 = vperm.slane %v628_v4, 0  ;;  %549 = vrcp.f32 %v593_v10  ;;  %v473_v22 = vld [vmem:[%s805_s1 + $0x40] sm:$0xf]  ;;  %v532_v26 = vld [vmem:[%s805_s1 + $0x34] sm:$0xf0]  ;;  %v91_v43 = vperm.slane %v628_v4, 1 }
   0x6   :  { %v474_v25 = vor.u32 %v533_v23, %v473_v22  ;;  %v470_v27 = vor.u32 %v532_v26, %v469_v24  ;;  %v465_v28 = vld [vmem:[%s805_s1 + $0x20] sm:$0xf]  ;;  %v531_v29 = vld [vmem:[%s805_s1 + $0x24] sm:$0xf0]  ;;  %v461_v31 = vld [vmem:[%s805_s1 + $0x10] sm:$0xf] }
   0x7   :  { %457 = vmatmul.msk.bf16.vlgmr.msra.gmra.mxu0 %vm44_vm0, %v34_v3  ;;  %v466_v30 = vor.u32 %v531_v29, %v465_v28  ;;  %v530_v32 = vld [vmem:[%s805_s1 + $0x14] sm:$0xf0]  ;;  %v93_v46 = vperm.slane %v628_v4, 2  ;;  %v486_v2 = vld [vmem:[%s805_s1 + $0x60] sm:$0xf]  ;;  %vm214_vm10 = vcmask 261120  }
   0x8   :  { %180 = vmatpush.bf16.msra.mxu1 %v474_v25  ;;  %v462_v35 = vor.u32 %v530_v32, %v461_v31  ;;  %v537_v3 = vld [vmem:[%s805_s1 + $0x64] sm:$0xf0]  ;;  %v478_v32 = vld [vmem:[%s805_s1 + $0x50] sm:$0xf]  ;;  %vm277_vm11 = vcmask 1043456   ;;  %vm273_vm12 = vcmask 31744  }
   0xb   :  { %v550_v11 = vpop.eup %549 }
   0xc   :  { %v66_v12 = vmul.f32 64.0, %v550_v11  ;;  %vm70_vm2 = vweird.f32 %v550_v11  ;;  %181 = vmatpush.bf16.msra.mxu1 %v470_v27 }
   0xe   :  { %v67_v13 = vsub.f32 1.0, %v66_v12 }
  0x10   :  { %v68_v14 = vmul.f32 %v550_v11, %v67_v13  ;;  %182 = vmatpush.bf16.msra.mxu1 %v466_v30 }
  0x12   :  { %v69_v15 = vadd.f32 %v550_v11, %v68_v14 }
  0x14   :  { %v71_v16 = vsel %vm70_vm2, %v550_v11, %v69_v15  ;;  %183 = vmatpush.bf16.msra.mxu1 %v462_v35 }
  0x84   :  { %v57_v6 = vpop.f32.mrf.mxu0 }
  0x85   :  { %v58_v7 = vadd.f32 %v57_v6, %v37_v5  ;;  %v536_v5 = vld [vmem:[%s805_s1 + $0x64] sm:$0xf] }
  0x87   :  { %v62_v8 = vsel %vm61_vm1, %v58_v7, 0.0 }
  0x88   :  { %63 = vadd.xlane.f32.xlu0 %v62_v8  ;;  %v488_v8 = vld [vmem:[%s805_s1 + $0x68] sm:$0xf0] }
  0x8c   :  { %v59_v9 = vpop.f32.mrf.mxu0 }
  0x8d   :  { %v491_v9 = vor.u32 %v536_v5, %v488_v8  ;;  %v545_v8 = vld [vmem:[%s805_s1 + $0xe4] sm:$0xf0] }
  0x8f   :  { %237 = vmatpush.bf16.msrb.mxu1 %v491_v9  ;;  %v522_v9 = vld [vmem:[%s805_s1 + $0xd0] sm:$0xf] }
  0xfb   :  { %v64_v17 = vpop.xlane.xlu0 %63 }
  0xfc   :  { %v72_v18 = vmul.f32 %v71_v16, %v64_v17 }
  0xfe   :  { %v73_v19 = vsub.f32 %v58_v7, %v72_v18  ;;  %v487_v7 = vor.u32 %v537_v3, %v486_v2 }
 0x100   :  { %v74_v20 = vmul.f32 %v73_v19, %v73_v19  ;;  %224 = vmatpush.bf16.msra.mxu2 %v487_v7  ;;  %v526_v7 = vld [vmem:[%s805_s1 + $0xe0] sm:$0xf] }
 0x102   :  { %v75_v21 = vsel %vm61_vm1, %v74_v20, 0.0 }
 0x103   :  { %76 = vadd.xlane.f32.xlu0 %v75_v21 }
 0x176   :  { %v77_v33 = vpop.xlane.xlu0 %76 }
 0x177   :  { %v78_v34 = vmul.f32 %v77_v33, %v71_v16  ;;  %v535_v33 = vld [vmem:[%s805_s1 + $0x54] sm:$0xf0] }
 0x178   :  { %v479_v35 = vor.u32 %v535_v33, %v478_v32  ;;  %v538_v32 = vld [vmem:[%s805_s1 + $0x74] sm:$0xf0] }
 0x179   :  { %v79_v36 = vadd.f32 1e-05, %v78_v34  ;;  %v534_v34 = vld [vmem:[%s805_s1 + $0x54] sm:$0xf] }
 0x17a   :  { %225 = vmatpush.bf16.msra.mxu2 %v479_v35 }
 0x17b   :  { %551 = vrsqrt.f32 %v79_v36  ;;  %vm86_vm4 = vweird.f32 %v79_v36 }
 0x181   :  { %v552_v37 = vpop.eup %551 }
 0x182   :  { %v81_v38 = vmul.f32 %v552_v37, %v79_v36  ;;  %vm87_vm3 = vweird.f32 %v552_v37  ;;  %v480_v36 = vld [vmem:[%s805_s1 + $0x58] sm:$0xf0] }
 0x183   :  { %vm88_vm5 = vmor %vm86_vm4, %vm87_vm3 }
 0x184   :  { %v82_v39 = vmul.f32 %v552_v37, %v81_v38  ;;  %v148_v38 = vperm.slane %v628_v4, 3 }
 0x186   :  { %v83_v40 = vmul.f32 0.5, %v82_v39 }
 0x188   :  { %v84_v41 = vsub.f32 1.5, %v83_v40 }
 0x18a   :  { %v85_v42 = vmul.f32 %v552_v37, %v84_v41 }
 0x18c   :  { %v89_v44 = vsel %vm88_vm5, %v552_v37, %v85_v42  ;;  %v483_v37 = vor.u32 %v534_v34, %v480_v36 }
 0x18d   :  { %v90_v45 = vmul.f32 %v89_v44, %v73_v19  ;;  %v32_v44 = vld [vmem:[%s806_s2 + $0x80] sm:$0xff] }
 0x18e   :  { %238 = vmatpush.bf16.msrb.mxu1 %v483_v37  ;;  %v381_v37 = vperm.slane %v628_v4, 5 }
 0x18f   :  { %v92_v47 = vmul.f32 %v91_v43, %v90_v45  ;;  %v33_v43 = vld [vmem:[%s806_s2 + $0x88] sm:$0xff]  ;;  %v31_v45 = vld [vmem:[%s806_s2 + $0x78] sm:$0xff] }
 0x190   :  { %251 = vmatpush.msrb.mxu0 %v33_v43 }
 0x191   :  { %v94_v48 = vadd.f32 %v93_v46, %v92_v47  ;;  %v30_v46 = vld [vmem:[%s806_s2 + $0x70] sm:$0xff]  ;;  %v29_v47 = vld [vmem:[%s806_s2 + $0x68] sm:$0xff] }
 0x192   :  { %252 = vmatpush.msrb.mxu0 %v32_v44  ;;  %v594_v44 = vmov 32.0  }
 0x193   :  { %v96_v49 = vmul.f32 0.70710677, %v94_v48  ;;  %v95_v28 = vmul.f32 0.5, %v94_v48  ;;  %v28_v48 = vld [vmem:[%s806_s2 + $0x60] sm:$0xff] }
 0x194   :  { %253 = vmatpush.msrb.mxu0 %v31_v45 }
 0x195   :  { %v97_v50 = vmul.f32 %v96_v49, %v96_v49 }
 0x196   :  { %254 = vmatpush.msrb.mxu0 %v30_v46 }
 0x197   :  { %v98_v51 = vmin.f32 %v97_v50, 16.0  ;;  %v26_v50 = vld [vmem:[%s806_s2 + $0x50] sm:$0xff] }
 0x198   :  { %255 = vmatpush.msrb.mxu0 %v29_v47 }
 0x199   :  { %v99_v52 = vmul.f32 2.1237322e-06, %v98_v51  ;;  %v110_v53 = vmul.f32 3.8918573e-05, %v98_v51 }
 0x19a   :  { %256 = vmatpush.msrb.mxu0 %v28_v48 }
 0x19b   :  { %v100_v54 = vadd.f32 0.00028619796, %v99_v52  ;;  %v111_v55 = vadd.f32 0.001143296, %v110_v53  ;;  %v24_v52 = vld [vmem:[%s806_s2 + $0x40] sm:$0xff] }
 0x19d   :  { %v101_v56 = vmul.f32 %v100_v54, %v98_v51  ;;  %v112_v57 = vmul.f32 %v111_v55, %v98_v51  ;;  %v244_v54 = vperm.slane %v628_v4, 4 }
 0x19f   :  { %v102_v58 = vadd.f32 0.0036580483, %v101_v56  ;;  %v113_v59 = vadd.f32 0.014752088, %v112_v57 }
 0x1a1   :  { %v114_v60 = vmul.f32 %v113_v59, %v98_v51  ;;  %v103_v61 = vmul.f32 %v102_v58, %v98_v51  ;;  %v23_v59 = vld [vmem:[%s806_s2 + $0x38] sm:$0xff] }
 0x1a3   :  { %v115_v62 = vadd.f32 0.112945676, %v114_v60  ;;  %v104_v0 = vadd.f32 0.05243302, %v103_v61  ;;  %v22_v60 = vld [vmem:[%s806_s2 + $0x30] sm:$0xff]  ;;  %v21_v61 = vld [vmem:[%s806_s2 + $0x28] sm:$0xff] }
 0x1a5   :  { %v116_v63 = vmul.f32 %v115_v62, %v98_v51  ;;  %v105_v11 = vmul.f32 %v104_v0, %v98_v51  ;;  %v20_v62 = vld [vmem:[%s806_s2 + $0x20] sm:$0xff]  ;;  %v18_v0 = vld [vmem:[%s806_s2 + $0x10] sm:$0xff] }
 0x1a7   :  { %v117_v1 = vadd.f32 0.4994258, %v116_v63  ;;  %v106_v12 = vadd.f32 0.18741608, %v105_v11  ;;  %v19_v63 = vld [vmem:[%s806_s2 + $0x18] sm:$0xff] }
 0x1a8   :  { %v544_v11 = vld [vmem:[%s805_s1 + $0xd4] sm:$0xf0] }
 0x1a9   :  { %v118_v6 = vmul.f32 %v117_v1, %v98_v51  ;;  %v107_v14 = vmul.f32 %v106_v12, %v98_v51  ;;  %v25_v51 = vld [vmem:[%s806_s2 + $0x48] sm:$0xff]  ;;  %v523_v12 = vor.u32 %v544_v11, %v522_v9 }
 0x1aa   :  { %v17_v1 = vld [vmem:[%s806_s2 + $0x8] sm:$0xf] }
 0x1ab   :  { %v119_v10 = vadd.f32 1.0, %v118_v6  ;;  %v108_v18 = vadd.f32 1.1283791, %v107_v14  ;;  %494 = vmatpush.msk.msrb.mxu2 %vm277_vm11, %v17_v1  ;;  %v543_v14 = vld [vmem:[%s805_s1 + $0xc4] sm:$0xf0]  ;;  %v412_v1 = vperm.slane %v628_v4, 6 }
 0x1ad   :  { %553 = vrcp.f32 %v119_v10  ;;  %v131_v17 = vand.u32 2147483648, %v119_v10  ;;  %v129_v20 = vand.u32 2147483647, %v119_v10  ;;  %vm125_vm7 = vweird.f32 %v119_v10 }
 0x1ae   :  { %v109_v23 = vmul.f32 %v108_v18, %v96_v49  ;;  %v27_v49 = vld [vmem:[%s806_s2 + $0x58] sm:$0xff]  ;;  %s444_s2 = sshll.u32 %s807_s3, 4  ;;  %s445_s2 = int_to_ptr.hbm [resolvable:$true] %s444_s2 }
 0x1af   :  { %v132_v22 = vor.u32 1.1754944e-38, %v131_v17  ;;  %vm130_vm9 = vcmp.eq.f32.partialorder %v129_v20, 8.507059e+37  ;;  %257 = vmatpush.msrb.mxu0 %v27_v49  ;;  %v542_v17 = vld [vmem:[%s805_s1 + $0xb4] sm:$0xf0]  ;;  %v541_v20 = vld [vmem:[%s805_s1 + $0xa4] sm:$0xf0] }
 0x1b1   :  { %258 = vmatpush.msrb.mxu0 %v26_v50 }
 0x1b3   :  { %v554_v13 = vpop.eup %553  ;;  %259 = vmatpush.msrb.mxu0 %v25_v51 }
 0x1b4   :  { %v121_v15 = vmul.f32 %v554_v13, %v119_v10  ;;  %vm126_vm6 = vweird.f32 %v554_v13  ;;  %v527_v10 = vor.u32 %v545_v8, %v526_v7 }
 0x1b5   :  { %vm127_vm8 = vmor %vm125_vm7, %vm126_vm6  ;;  %260 = vmatpush.msrb.mxu0 %v24_v52 }
 0x1b6   :  { %v122_v16 = vsub.f32 1.0, %v121_v15  ;;  %367 = vmatpush.bf16.msra.mxu3 %v527_v10 }
 0x1b7   :  { %261 = vmatpush.msrb.mxu0 %v23_v59 }
 0x1b8   :  { %v123_v19 = vmul.f32 %v554_v13, %v122_v16  ;;  %v514_v16 = vld [vmem:[%s805_s1 + $0xb0] sm:$0xf] }
 0x1b9   :  { %262 = vmatpush.msrb.mxu0 %v22_v60  ;;  %v515_v18 = vor.u32 %v542_v17, %v514_v16 }
 0x1ba   :  { %v124_v21 = vadd.f32 %v554_v13, %v123_v19  ;;  %368 = vmatpush.bf16.msra.mxu3 %v523_v12  ;;  %v510_v19 = vld [vmem:[%s805_s1 + $0xa0] sm:$0xf] }
 0x1bb   :  { %263 = vmatpush.msrb.mxu0 %v21_v61 }
 0x1bc   :  { %v128_v24 = vsel %vm127_vm8, %v554_v13, %v124_v21  ;;  %v518_v13 = vld [vmem:[%s805_s1 + $0xc0] sm:$0xf]  ;;  %v511_v21 = vor.u32 %v541_v20, %v510_v19 }
 0x1bd   :  { %v133_v25 = vsel %vm130_vm9, %v132_v22, %v128_v24  ;;  %264 = vmatpush.msrb.mxu0 %v20_v62  ;;  %v519_v15 = vor.u32 %v543_v14, %v518_v13  ;;  %v506_v22 = vld [vmem:[%s805_s1 + $0x90] sm:$0xf] }
 0x1be   :  { %v134_v26 = vmul.f32 %v133_v25, %v109_v23  ;;  %v540_v23 = vld [vmem:[%s805_s1 + $0x94] sm:$0xf0]  ;;  %v502_v25 = vld [vmem:[%s805_s1 + $0x80] sm:$0xf] }
 0x1bf   :  { %265 = vmatpush.msrb.mxu0 %v19_v63  ;;  %369 = vmatpush.bf16.msra.mxu3 %v519_v15  ;;  %v507_v24 = vor.u32 %v540_v23, %v506_v22 }
 0x1c0   :  { %v458_v27 = vclamps-f32 %v134_v26, 1.0  ;;  %v539_v26 = vld [vmem:[%s805_s1 + $0x84] sm:$0xf0] }
 0x1c1   :  { %266 = vmatpush.msrb.mxu0 %v18_v0 }
 0x1c2   :  { %v137_v29 = vadd.f32 1.0, %v458_v27 }
 0x1c3   :  { %370 = vmatpush.bf16.msra.mxu3 %v515_v18 }
 0x1c4   :  { %v138_v30 = vmul.f32 %v137_v29, %v95_v28  ;;  %v503_v29 = vor.u32 %v539_v26, %v502_v25 }
 0x1c6   :  { %v147_v31 = vpack.c.bf16 %v138_v30, %v138_v30 }
 0x1c7   :  { %371 = vmatpush.bf16.msra.mxu3 %v511_v21 }
 0x1c8   :  { %475 = vmatmul.msk.bf16.vlgmr.msra.gmra.mxu1 %vm61_vm1, %v147_v31  ;;  %v498_v31 = vld [vmem:[%s805_s1 + $0x70] sm:$0xf]  ;;  %s595_s1 = smov [#allocation2]  }
 0x1c9   :  { %v499_v33 = vor.u32 %v538_v32, %v498_v31  ;;  %s442_s5 = sshll.u32 %s595_s1, 4  ;;  %s443_s5 = int_to_ptr.vmem [resolvable:$true] %s442_s5 }
 0x1cb   :  { %372 = vmatpush.bf16.msra.mxu3 %v507_v24 }
 0x1cf   :  { %373 = vmatpush.bf16.msra.mxu3 %v503_v29 }
 0x1d3   :  { %374 = vmatpush.bf16.msra.mxu3 %v499_v33 }
 0x245   :  { %v185_v39 = vpop.f32.mrf.mxu1 }
 0x246   :  { %v685_v40 = vadd.f32 %v185_v39, %v148_v38 }
 0x248   :  { %v193_v41 = vpack.c.bf16 %v685_v40, %v685_v40 }
 0x24a   :  { %492 = vmatmul.msk.bf16.vlgmr.msra.gmra.mxu2 %vm214_vm10, %v193_v41  ;;  %493 = vmatmul.msk.bf16.vlgmr.msrb.gmra.mxu1 %vm214_vm10, %v193_v41 }
 0x24d   :  { %v187_v42 = vpop.f32.mrf.mxu1 }
 0x2c7   :  { %v721_v53 = vpop.f32.mrf.mxu1 }
 0x2cd   :  { %v227_v55 = vpop.f32.mrf.mxu2 }
 0x2ce   :  { %v245_v56 = vadd.f32 %v244_v54, %v227_v55 }
 0x2cf   :  { %v242_v57 = vpop.f32.mrf.mxu1 }
 0x2d0   :  { %246 = vmax.xlane.f32.xlu1 %v245_v56 }
 0x2d5   :  { %v229_v58 = vpop.f32.mrf.mxu2 }
 0x343   :  { %v247_v2 = vpop.xlane.xlu1 %246 }
 0x344   :  { %v248_v3 = vsub.f32 %v245_v56, %v247_v2 }
 0x346   :  { %v249_v5 = vmul.f32 1.442695, %v248_v3  ;;  %v414_v3 = vperm.slane %v628_v4, 7 }
 0x348   :  { %555 = vpow2.f32 %v249_v5 }
 0x34e   :  { %v556_v6 = vpop.eup %555 }
 0x34f   :  { %267 = vmatmul.f32.vlgmr.msrb.gmra.mxu0 %v556_v6 }
 0x3cc   :  { %v268_v27 = vpop.f32.mrf.mxu0 }
 0x3cd   :  { %v271_v28 = vmax.f32 %v268_v27, 1e-30 }
 0x3cf   :  { %557 = vrcp.f32 %v271_v28 }
 0x3d0   :  { %559 = vrcp.f32 %v594_v44 }
 0x3d5   :  { %v558_v30 = vpop.eup %557 }
 0x3d6   :  { %495 = vmatmul.msk.f32.vlgmr.msrb.gmra.mxu2 %vm273_vm12, %v558_v30  ;;  %v560_v45 = vpop.eup %559 }
 0x3d7   :  { %v387_v46 = vmul.f32 32.0, %v560_v45  ;;  %vm391_vm13 = vweird.f32 %v560_v45 }
 0x3d9   :  { %v388_v47 = vsub.f32 1.0, %v387_v46 }
 0x3db   :  { %v389_v48 = vmul.f32 %v560_v45, %v388_v47 }
 0x3dd   :  { %v390_v49 = vadd.f32 %v560_v45, %v389_v48 }
 0x3df   :  { %v392_v50 = vsel %vm391_vm13, %v560_v45, %v390_v49 }
 0x459   :  { %v298_v34 = vpop.f32.mrf.mxu2 }
 0x45a   :  { %v301_v35 = vmul.f32 %v556_v6, %v298_v34 }
 0x45c   :  { %v318_v36 = vpack.c.bf16 %v301_v35, %v301_v35 }
 0x45e   :  { %375 = vmatmul.bf16.vlgmr.msra.gmra.mxu3 %v318_v36 }
 0x4e1   :  { %v376_v38 = vpop.f32.mrf.mxu3 }
 0x4e2   :  { %v380_v39 = vadd.f32 %v376_v38, %v721_v53 }
 0x4e4   :  { %v382_v41 = vadd.f32 %v381_v37, %v380_v39 }
 0x4e6   :  { %v383_v42 = vsel %vm214_vm10, %v382_v41, 0.0 }
 0x4e7   :  { %384 = vadd.xlane.f32.xlu1 %v383_v42 }
 0x4e9   :  { %v378_v43 = vpop.f32.mrf.mxu3 }
 0x55a   :  { %v385_v51 = vpop.xlane.xlu1 %384 }
 0x55b   :  { %v393_v52 = vmul.f32 %v392_v50, %v385_v51 }
 0x55d   :  { %v394_v54 = vsub.f32 %v382_v41, %v393_v52 }
 0x55f   :  { %v395_v55 = vmul.f32 %v394_v54, %v394_v54 }
 0x561   :  { %v396_v53 = vsel %vm214_vm10, %v395_v55, 0.0 }
 0x562   :  { %397 = vadd.xlane.f32.xlu2 %v396_v53 }
 0x5d5   :  { %v398_v56 = vpop.xlane.xlu2 %397 }
 0x5d6   :  { %v399_v57 = vmul.f32 %v398_v56, %v392_v50 }
 0x5d8   :  { %v400_v58 = vadd.f32 1e-05, %v399_v57 }
 0x5da   :  { %561 = vrsqrt.f32 %v400_v58  ;;  %vm407_vm15 = vweird.f32 %v400_v58 }
 0x5e0   :  { %v562_v59 = vpop.eup %561 }
 0x5e1   :  { %v402_v60 = vmul.f32 %v562_v59, %v400_v58  ;;  %vm408_vm14 = vweird.f32 %v562_v59 }
 0x5e2   :  { %vm409_vm0 = vmor %vm407_vm15, %vm408_vm14 }
 0x5e3   :  { %v403_v61 = vmul.f32 %v562_v59, %v402_v60 }
 0x5e5   :  { %v404_v62 = vmul.f32 0.5, %v403_v61 }
 0x5e7   :  { %v405_v63 = vsub.f32 1.5, %v404_v62 }
 0x5e9   :  { %v406_v0 = vmul.f32 %v562_v59, %v405_v63 }
 0x5eb   :  { %v410_v2 = vsel %vm409_vm0, %v562_v59, %v406_v0 }
 0x5ec   :  { %v411_v5 = vmul.f32 %v410_v2, %v394_v54 }
 0x5ee   :  { %v413_v6 = vmul.f32 %v412_v1, %v411_v5 }
 0x5f0   :  { %v415_v7 = vadd.f32 %v414_v3, %v413_v6 }
 0x5f2   :  { %v528_v8 = vmul.f32 -1.442695, %v415_v7 }
 0x5f4   :  { %563 = vpow2.f32 %v528_v8 }
 0x5fa   :  { %v564_v9 = vpop.eup %563 }
 0x5fb   :  { %v419_v10 = vadd.f32 1.0, %v564_v9 }
 0x5fd   :  { %565 = vrcp.f32 %v419_v10  ;;  %v431_v14 = vand.u32 2147483648, %v419_v10  ;;  %v429_v16 = vand.u32 2147483647, %v419_v10  ;;  %vm425_vm2 = vweird.f32 %v419_v10 }
 0x5ff   :  { %v432_v18 = vor.u32 1.1754944e-38, %v431_v14  ;;  %vm430_vm4 = vcmp.eq.f32.partialorder %v429_v16, 8.507059e+37 }
 0x603   :  { %v566_v11 = vpop.eup %565 }
 0x604   :  { %v421_v12 = vmul.f32 %v566_v11, %v419_v10  ;;  %vm426_vm1 = vweird.f32 %v566_v11 }
 0x605   :  { %vm427_vm3 = vmor %vm425_vm2, %vm426_vm1 }
 0x606   :  { %v422_v13 = vsub.f32 1.0, %v421_v12 }
 0x608   :  { %v423_v15 = vmul.f32 %v566_v11, %v422_v13 }
 0x60a   :  { %v424_v17 = vadd.f32 %v566_v11, %v423_v15 }
 0x60c   :  { %v428_v4 = vsel %vm427_vm3, %v566_v11, %v424_v17 }
 0x60d   :  { %v433_v19 = vsel %vm430_vm4, %v432_v18, %v428_v4 }
 0x60e   :  { %v435_v20 = vmul.f32 %v433_v19, %v685_v40 }
 0x610   :  { %436 = vst.msk [vmem:[#allocation2] sm:$0xff] %vm214_vm10, %v435_v20 }
 0x611   :  { %447 = dma.vmem_to_hbm [thread:$0]  %s443_s5, 128, %s445_s2, [#allocation3]  }
 0x612   :  { %591 = dma.done.wait [#allocation3], 128  }
 0x613   :  { %592 = vsyncadd [#allocation3], 4294967168 }
 0x614   :  { %452 = vsyncpa [#allocation3], 1 }

</bundles_post_ra>
